<compile_context>
chip_gen: v5e
topology: v5e:2x2
jax: 0.10.0
libtpu: 0.0.40
codegen_flags: <defaults>
</compile_context>

<pallas_src>
import math

import jax
import jax.numpy as jnp
from jax.experimental import pallas as pl
from jax.experimental.pallas import tpu as pltpu

# ---- small synthetic BERT config (shapes implied by BertConfig / BertForSequenceClassification)
VOCAB = 64          # vocab_size
MAX_POS = 16        # max_position_embeddings
TYPE_VOCAB = 2      # type_vocab_size
HIDDEN = 32         # hidden_size
LAYERS = 2          # num_hidden_layers
HEADS = 2           # num_attention_heads
HEAD_DIM = HIDDEN // HEADS
INTER = 64          # intermediate_size
LABELS = 2          # num_labels
B = 2               # batch
S = 8               # sequence length
LN_EPS = 1e-12      # BERT LayerNorm eps
LOGIT_PAD = 128     # lane-dense logits slab


def bert_kernel(emb_ref, bias_ref, emb_g_ref, emb_b_ref,
                wqkv_ref, bqkv_ref, woh_ref, bo_ref,
                ln1g_ref, ln1b_ref, w1_ref, b1_ref, w2_ref, b2_ref,
                ln2g_ref, ln2b_ref, wp_ref, bp_ref, wc_ref, bc_ref,
                out_ref, x_ref):
    """One (batch element, layer) grid step of the BERT encoder + pooler/classifier tail.

    Grid = (batch, layer); the residual stream for this batch element persists in the
    VMEM scratch `x_ref` across the (arbitrary) layer axis.
    """
    l = pl.program_id(1)
    bf = jnp.bfloat16

    def layernorm(v, g, b):
        mu = jnp.mean(v, axis=-1, keepdims=True)
        var = jnp.mean((v - mu) ** 2, axis=-1, keepdims=True)
        return (v - mu) * jax.lax.rsqrt(var + LN_EPS) * g + b

    def gelu(v):
        # TODO(synk): HF BERT default act is exact erf-GELU; tanh approximation used here
        # because erf has no guaranteed Mosaic lowering.
        c = math.sqrt(2.0 / math.pi)
        return 0.5 * v * (1.0 + jnp.tanh(c * (v + 0.044715 * v * v * v)))

    # ---- layer 0: summed embeddings -> embedding LayerNorm -> residual scratch
    @pl.when(l == 0)
    def _():
        x_ref[...] = layernorm(emb_ref[0], emb_g_ref[...], emb_b_ref[...])   # (S, H) f32

    x = x_ref[...]                                     # (S, H) f32 residual stream
    xb = x.astype(bf)

    # ---- fused QKV projection: one (S,H)x(H,3H) bf16 MXU matmul.
    # Q weight columns were pre-scaled by 1/sqrt(Dh) in the wrapper.
    qkv = jnp.dot(xb, wqkv_ref[0], preferred_element_type=jnp.float32) + bqkv_ref[0]  # (S, 3H)

    # ---- head split: columns are ordered [q_h0..q_hH, k_h0.., v_h0..] so each 16-lane
    # chunk is one (tensor, head); stack them head-leading once.
    qkv_h = jnp.stack(
        [qkv[:, g * HEAD_DIM:(g + 1) * HEAD_DIM] for g in range(3 * HEADS)], axis=0)
    q = qkv_h[:HEADS].astype(bf)                       # (HEADS, S, Dh)
    k = qkv_h[HEADS:2 * HEADS].astype(bf)
    v = qkv_h[2 * HEADS:].astype(bf)

    # ---- batched attention over the leading head axis; mask bias broadcasts from (1,1,S).
    scores = jnp.einsum('hqd,hkd->hqk', q, k,
                        preferred_element_type=jnp.float32) + bias_ref[...]   # (HEADS,S,S)
    m = jnp.max(scores, axis=-1, keepdims=True)
    e = jnp.exp(scores - m)
    p = e * pl.reciprocal(jnp.sum(e, axis=-1, keepdims=True), approx=True)    # softmax (f32)
    ctx = jnp.einsum('hqk,hkd->hqd', p.astype(bf), v,
                     preferred_element_type=jnp.float32)                      # (HEADS,S,Dh)

    # ---- per-head output projection folded over heads (no ctx lane re-concat).
    attn = jnp.einsum('hqd,hdo->hqo', ctx.astype(bf), woh_ref[0],
                      preferred_element_type=jnp.float32).sum(axis=0) + bo_ref[0]
    x = layernorm(x + attn, ln1g_ref[0], ln1b_ref[0])                         # add & norm

    # ---- FFN (GELU kept in f32; bf16 only at the dot inputs).
    h1 = gelu(jnp.dot(x.astype(bf), w1_ref[0],
                      preferred_element_type=jnp.float32) + b1_ref[0])
    h2 = jnp.dot(h1.astype(bf), w2_ref[0],
                 preferred_element_type=jnp.float32) + b2_ref[0]
    x = layernorm(x + h2, ln2g_ref[0], ln2b_ref[0])                           # add & norm
    x_ref[...] = x

    # ---- last layer: pooler (tanh on CLS) + classifier, lane-dense padded store.
    @pl.when(l == LAYERS - 1)
    def _():
        cls = x[0:1, :]                                                       # (1, H)
        pooled = jnp.tanh(jnp.dot(cls.astype(bf), wp_ref[...],
                                  preferred_element_type=jnp.float32) + bp_ref[...])
        logits = jnp.dot(pooled.astype(bf), wc_ref[...],
                         preferred_element_type=jnp.float32) + bc_ref[...]    # (1, 128)
        out_ref[0] = logits


def init_params(key):
    std = 0.02
    keys = iter(jax.random.split(key, 40))
    n = lambda shape: (std * jax.random.normal(next(keys), shape)).astype(jnp.float32)
    return {
        # embeddings
        "word_emb": n((VOCAB, HIDDEN)),
        "pos_emb": n((MAX_POS, HIDDEN)),
        "type_emb": n((TYPE_VOCAB, HIDDEN)),
        "emb_g": jnp.ones((1, HIDDEN), jnp.float32),
        "emb_b": jnp.zeros((1, HIDDEN), jnp.float32),
        # stacked per-layer encoder weights
        "wq": n((LAYERS, HIDDEN, HIDDEN)), "bq": jnp.zeros((LAYERS, 1, HIDDEN), jnp.float32),
        "wk": n((LAYERS, HIDDEN, HIDDEN)), "bk": jnp.zeros((LAYERS, 1, HIDDEN), jnp.float32),
        "wv": n((LAYERS, HIDDEN, HIDDEN)), "bv": jnp.zeros((LAYERS, 1, HIDDEN), jnp.float32),
        "wo": n((LAYERS, HIDDEN, HIDDEN)), "bo": jnp.zeros((LAYERS, 1, HIDDEN), jnp.float32),
        "ln1g": jnp.ones((LAYERS, 1, HIDDEN), jnp.float32),
        "ln1b": jnp.zeros((LAYERS, 1, HIDDEN), jnp.float32),
        "w1": n((LAYERS, HIDDEN, INTER)), "b1": jnp.zeros((LAYERS, 1, INTER), jnp.float32),
        "w2": n((LAYERS, INTER, HIDDEN)), "b2": jnp.zeros((LAYERS, 1, HIDDEN), jnp.float32),
        "ln2g": jnp.ones((LAYERS, 1, HIDDEN), jnp.float32),
        "ln2b": jnp.zeros((LAYERS, 1, HIDDEN), jnp.float32),
        # pooler + classifier
        "wp": n((HIDDEN, HIDDEN)), "bp": jnp.zeros((1, HIDDEN), jnp.float32),
        "wc": n((HIDDEN, LABELS)), "bc": jnp.zeros((1, LABELS), jnp.float32),
    }


@jax.jit
def charbert_classifier(params, input_ids, attention_mask, token_type_ids):
    bf = jnp.bfloat16
    # ---- embedding table gathers (word + position + token_type) in plain JAX
    # TODO(synk): at real vocab sizes, move this into the kernel via PrefetchScalarGridSpec
    # (scalar-prefetched ids + DMA row gathers) so the gather hides behind layer-0 compute.
    positions = jnp.arange(S, dtype=jnp.int32)[None, :]
    emb = (params["word_emb"][input_ids]
           + params["pos_emb"][positions]
           + params["type_emb"][token_type_ids]).astype(jnp.float32)          # (B, S, H)

    # additive attention mask bias kept small: (B, 1, S); broadcast happens in-kernel
    attn_bias = ((1.0 - attention_mask.astype(jnp.float32)) * (-1e9))[:, None, :]

    # ---- fused QKV weights (bf16), 1/sqrt(Dh) folded into the Q columns (free at prep time)
    scale = 1.0 / math.sqrt(HEAD_DIM)
    wqkv = jnp.concatenate([params["wq"] * scale, params["wk"], params["wv"]],
                           axis=-1).astype(bf)                                 # (L, H, 3H)
    bqkv = jnp.concatenate([params["bq"] * scale, params["bk"], params["bv"]],
                           axis=-1)                                            # (L, 1, 3H) f32
    # per-head output projection (L, HEADS, Dh, H) so the kernel can fold it over heads
    woh = params["wo"].reshape(LAYERS, HEADS, HEAD_DIM, HIDDEN).astype(bf)
    # lane-dense classifier head: pad LABELS -> 128 lanes (sliced back after the call)
    wc_pad = jnp.zeros((HIDDEN, LOGIT_PAD), jnp.float32).at[:, :LABELS].set(
        params["wc"]).astype(bf)
    bc_pad = jnp.zeros((1, LOGIT_PAD), jnp.float32).at[:, :LABELS].set(params["bc"])

    args = [
        emb, attn_bias, params["emb_g"], params["emb_b"],
        wqkv, bqkv, woh, params["bo"],
        params["ln1g"], params["ln1b"],
        params["w1"].astype(bf), params["b1"], params["w2"].astype(bf), params["b2"],
        params["ln2g"], params["ln2b"],
        params["wp"].astype(bf), params["bp"], wc_pad, bc_pad,
    ]

    batch_map = lambda b, l: (b, 0, 0)        # per-batch-element tiles
    layer3_map = lambda b, l: (l, 0, 0)       # per-layer weight tiles (double-buffered)
    const2_map = lambda b, l: (0, 0)          # shared small params

    in_specs = [
        pl.BlockSpec((1, S, HIDDEN), batch_map),                       # emb
        pl.BlockSpec((1, 1, S), batch_map),                            # attn_bias
        pl.BlockSpec((1, HIDDEN), const2_map),                         # emb_g
        pl.BlockSpec((1, HIDDEN), const2_map),                         # emb_b
        pl.BlockSpec((1, HIDDEN, 3 * HIDDEN), layer3_map),             # wqkv
        pl.BlockSpec((1, 1, 3 * HIDDEN), layer3_map),                  # bqkv
        pl.BlockSpec((1, HEADS, HEAD_DIM, HIDDEN), lambda b, l: (l, 0, 0, 0)),  # woh
        pl.BlockSpec((1, 1, HIDDEN), layer3_map),                      # bo
        pl.BlockSpec((1, 1, HIDDEN), layer3_map),                      # ln1g
        pl.BlockSpec((1, 1, HIDDEN), layer3_map),                      # ln1b
        pl.BlockSpec((1, HIDDEN, INTER), layer3_map),                  # w1
        pl.BlockSpec((1, 1, INTER), layer3_map),                       # b1
        pl.BlockSpec((1, INTER, HIDDEN), layer3_map),                  # w2
        pl.BlockSpec((1, 1, HIDDEN), layer3_map),                      # b2
        pl.BlockSpec((1, 1, HIDDEN), layer3_map),                      # ln2g
        pl.BlockSpec((1, 1, HIDDEN), layer3_map),                      # ln2b
        pl.BlockSpec((HIDDEN, HIDDEN), const2_map),                    # wp
        pl.BlockSpec((1, HIDDEN), const2_map),                         # bp
        pl.BlockSpec((HIDDEN, LOGIT_PAD), const2_map),                 # wc (padded)
        pl.BlockSpec((1, LOGIT_PAD), const2_map),                      # bc (padded)
    ]
    out_spec = pl.BlockSpec((1, 1, LOGIT_PAD), batch_map)

    # advisory cost estimate so XLA can schedule around the custom call
    enc_flops = LAYERS * B * (2 * S * HIDDEN * 3 * HIDDEN
                              + 2 * 2 * HEADS * S * S * HEAD_DIM
                              + 2 * S * HIDDEN * HIDDEN
                              + 4 * S * HIDDEN * INTER)
    head_flops = 2 * B * HIDDEN * HIDDEN + 2 * B * HIDDEN * LOGIT_PAD
    n_trans = B * (LAYERS * (HEADS * S * S + S * INTER) + HIDDEN)
    n_bytes = sum(int(a.size) * a.dtype.itemsize for a in args) + B * LOGIT_PAD * 4
    cost = pl.CostEstimate(flops=enc_flops + head_flops,
                           transcendentals=n_trans, bytes_accessed=n_bytes)

    logits_pad = pl.pallas_call(
        bert_kernel,
        out_shape=jax.ShapeDtypeStruct((B, 1, LOGIT_PAD), jnp.float32),
        grid=(B, LAYERS),
        in_specs=in_specs,
        out_specs=out_spec,
        scratch_shapes=[pltpu.VMEM((S, HIDDEN), jnp.float32)],      # residual stream
        compiler_params=pltpu.CompilerParams(
            dimension_semantics=("parallel", "arbitrary"),
            vmem_limit_bytes=32 * 1024 * 1024),
        cost_estimate=cost,
    )(*args)

    return logits_pad[:, 0, :LABELS]                                 # (B, LABELS) f32


if __name__ == "__main__":
    root = jax.random.PRNGKey(0)
    k_params, k_ids, k_mask = jax.random.split(root, 3)

    params = init_params(k_params)

    input_ids = jax.random.randint(k_ids, (B, S), 0, VOCAB, dtype=jnp.int32)
    # attention mask: last two tokens of batch element 1 are padding
    attention_mask = jnp.ones((B, S), jnp.int32).at[1, S - 2:].set(0)
    token_type_ids = jnp.zeros((B, S), jnp.int32)

    logits = charbert_classifier(params, input_ids, attention_mask, token_type_ids)
    logits = jax.block_until_ready(logits)
    assert logits.shape == (B, LABELS) and logits.dtype == jnp.float32
    print("KERNEL_OK")
</pallas_src>

<mosaic_0001>
module attributes {stable_mosaic.version = 11 : i64} {
  func.func @bert_kernel(%arg0: i32, %arg1: i32, %arg2: memref<1x8x32xf32, #tpu.memory_space<vmem>>, %arg3: memref<1x1x8xf32, #tpu.memory_space<vmem>>, %arg4: memref<1x32xf32, #tpu.memory_space<vmem>>, %arg5: memref<1x32xf32, #tpu.memory_space<vmem>>, %arg6: memref<1x32x96xbf16, #tpu.memory_space<vmem>>, %arg7: memref<1x1x96xf32, #tpu.memory_space<vmem>>, %arg8: memref<1x2x16x32xbf16, #tpu.memory_space<vmem>>, %arg9: memref<1x1x32xf32, #tpu.memory_space<vmem>>, %arg10: memref<1x1x32xf32, #tpu.memory_space<vmem>>, %arg11: memref<1x1x32xf32, #tpu.memory_space<vmem>>, %arg12: memref<1x32x64xbf16, #tpu.memory_space<vmem>>, %arg13: memref<1x1x64xf32, #tpu.memory_space<vmem>>, %arg14: memref<1x64x32xbf16, #tpu.memory_space<vmem>>, %arg15: memref<1x1x32xf32, #tpu.memory_space<vmem>>, %arg16: memref<1x1x32xf32, #tpu.memory_space<vmem>>, %arg17: memref<1x1x32xf32, #tpu.memory_space<vmem>>, %arg18: memref<32x32xbf16, #tpu.memory_space<vmem>>, %arg19: memref<1x32xf32, #tpu.memory_space<vmem>>, %arg20: memref<32x128xbf16, #tpu.memory_space<vmem>>, %arg21: memref<1x128xf32, #tpu.memory_space<vmem>>, %arg22: memref<1x1x128xf32, #tpu.memory_space<vmem>>, %arg23: memref<8x32xf32, #tpu.memory_space<vmem>>) attributes {dimension_semantics = [#tpu.dimension_semantics<parallel>, #tpu.dimension_semantics<arbitrary>], iteration_bounds = array<i64: 2, 2>, scalar_prefetch = 0 : i64, scratch_operands = 1 : i64, tpu.core_type = #tpu.core_type<tc>, window_params = [{transform_indices = @transform_0, window_bounds = array<i64: 1, 8, 32>}, {transform_indices = @transform_1, window_bounds = array<i64: 1, 1, 8>}, {pipeline_mode = #tpu.pipeline_mode<synchronous>, transform_indices = @transform_2, window_bounds = array<i64: 1, 32>}, {pipeline_mode = #tpu.pipeline_mode<synchronous>, transform_indices = @transform_3, window_bounds = array<i64: 1, 32>}, {transform_indices = @transform_4, window_bounds = array<i64: 1, 32, 96>}, {transform_indices = @transform_5, window_bounds = array<i64: 1, 1, 96>}, {transform_indices = @transform_6, window_bounds = array<i64: 1, 2, 16, 32>}, {transform_indices = @transform_7, window_bounds = array<i64: 1, 1, 32>}, {transform_indices = @transform_8, window_bounds = array<i64: 1, 1, 32>}, {transform_indices = @transform_9, window_bounds = array<i64: 1, 1, 32>}, {transform_indices = @transform_10, window_bounds = array<i64: 1, 32, 64>}, {transform_indices = @transform_11, window_bounds = array<i64: 1, 1, 64>}, {transform_indices = @transform_12, window_bounds = array<i64: 1, 64, 32>}, {transform_indices = @transform_13, window_bounds = array<i64: 1, 1, 32>}, {transform_indices = @transform_14, window_bounds = array<i64: 1, 1, 32>}, {transform_indices = @transform_15, window_bounds = array<i64: 1, 1, 32>}, {pipeline_mode = #tpu.pipeline_mode<synchronous>, transform_indices = @transform_16, window_bounds = array<i64: 32, 32>}, {pipeline_mode = #tpu.pipeline_mode<synchronous>, transform_indices = @transform_17, window_bounds = array<i64: 1, 32>}, {pipeline_mode = #tpu.pipeline_mode<synchronous>, transform_indices = @transform_18, window_bounds = array<i64: 32, 128>}, {pipeline_mode = #tpu.pipeline_mode<synchronous>, transform_indices = @transform_19, window_bounds = array<i64: 1, 128>}, {transform_indices = @transform_20, window_bounds = array<i64: 1, 1, 128>}]} {
    %c0_i32 = arith.constant 0 : i32
    %0 = arith.cmpi eq, %arg1, %c0_i32 : i32
    %1 = arith.extui %0 : i1 to i32
    %c0_i32_0 = arith.constant 0 : i32
    %2 = arith.cmpi ne, %1, %c0_i32_0 : i32
    scf.if %2 {
      %c0_67 = arith.constant 0 : index
      %c0_68 = arith.constant 0 : index
      %c0_69 = arith.constant 0 : index
      %143 = vector.load %arg2[%c0_67, %c0_68, %c0_69] : memref<1x8x32xf32, #tpu.memory_space<vmem>>, vector<1x8x32xf32>
      %144 = vector.shape_cast %143 : vector<1x8x32xf32> to vector<8x32xf32>
      %c0_70 = arith.constant 0 : index
      %c0_71 = arith.constant 0 : index
      %145 = vector.load %arg4[%c0_70, %c0_71] : memref<1x32xf32, #tpu.memory_space<vmem>>, vector<1x32xf32>
      %c0_72 = arith.constant 0 : index
      %c0_73 = arith.constant 0 : index
      %146 = vector.load %arg5[%c0_72, %c0_73] : memref<1x32xf32, #tpu.memory_space<vmem>>, vector<1x32xf32>
      %cst_74 = arith.constant dense<0.000000e+00> : vector<8xf32>
      %147 = vector.multi_reduction <add>, %144, %cst_74 [1] : vector<8x32xf32> to vector<8xf32>
      %148 = vector.shape_cast %147 : vector<8xf32> to vector<8x1xf32>
      %cst_75 = arith.constant 3.200000e+01 : f32
      %149 = vector.broadcast %cst_75 : f32 to vector<8x1xf32>
      %150 = arith.divf %148, %149 : vector<8x1xf32>
      %151 = vector.broadcast %150 : vector<8x1xf32> to vector<8x32xf32>
      %152 = arith.subf %144, %151 : vector<8x32xf32>
      %153 = arith.mulf %152, %152 : vector<8x32xf32>
      %cst_76 = arith.constant dense<0.000000e+00> : vector<8xf32>
      %154 = vector.multi_reduction <add>, %153, %cst_76 [1] : vector<8x32xf32> to vector<8xf32>
      %155 = vector.shape_cast %154 : vector<8xf32> to vector<8x1xf32>
      %cst_77 = arith.constant 3.200000e+01 : f32
      %156 = vector.broadcast %cst_77 : f32 to vector<8x1xf32>
      %157 = arith.divf %155, %156 : vector<8x1xf32>
      %158 = vector.broadcast %150 : vector<8x1xf32> to vector<8x32xf32>
      %159 = arith.subf %144, %158 : vector<8x32xf32>
      %cst_78 = arith.constant 9.99999996E-13 : f32
      %160 = vector.broadcast %cst_78 : f32 to vector<8x1xf32>
      %161 = arith.addf %157, %160 : vector<8x1xf32>
      %162 = math.rsqrt %161 : vector<8x1xf32>
      %163 = vector.broadcast %162 : vector<8x1xf32> to vector<8x32xf32>
      %164 = arith.mulf %159, %163 : vector<8x32xf32>
      %165 = vector.broadcast %145 : vector<1x32xf32> to vector<8x32xf32>
      %166 = arith.mulf %164, %165 : vector<8x32xf32>
      %167 = vector.broadcast %146 : vector<1x32xf32> to vector<8x32xf32>
      %168 = arith.addf %166, %167 : vector<8x32xf32>
      %c0_79 = arith.constant 0 : index
      %c0_80 = arith.constant 0 : index
      %169 = vector.load %arg23[%c0_79, %c0_80] : memref<8x32xf32, #tpu.memory_space<vmem>>, vector<8x32xf32>
      tpu.vector_store %arg23[%c0_79, %c0_80], %168 {strides = array<i32>} : memref<8x32xf32, #tpu.memory_space<vmem>>, vector<8x32xf32>,
    } else {
    }
    %c0 = arith.constant 0 : index
    %c0_1 = arith.constant 0 : index
    %3 = vector.load %arg23[%c0, %c0_1] : memref<8x32xf32, #tpu.memory_space<vmem>>, vector<8x32xf32>
    %4 = arith.truncf %3 : vector<8x32xf32> to vector<8x32xbf16>
    %c0_2 = arith.constant 0 : index
    %c0_3 = arith.constant 0 : index
    %c0_4 = arith.constant 0 : index
    %5 = vector.load %arg6[%c0_2, %c0_3, %c0_4] : memref<1x32x96xbf16, #tpu.memory_space<vmem>>, vector<1x32x96xbf16>
    %6 = vector.shape_cast %5 : vector<1x32x96xbf16> to vector<32x96xbf16>
    %cst = arith.constant dense<0.000000e+00> : vector<8x96xf32>
    %7 = tpu.matmul %4, %6, %cst {dimension_numbers = #tpu.dot_dimension_numbers<[1], [0], [0], [1], [0, 0, 1, 1], [], []>} : vector<8x32xbf16>, vector<32x96xbf16>, vector<8x96xf32> -> vector<8x96xf32>
    %c0_5 = arith.constant 0 : index
    %c0_6 = arith.constant 0 : index
    %c0_7 = arith.constant 0 : index
    %8 = vector.load %arg7[%c0_5, %c0_6, %c0_7] : memref<1x1x96xf32, #tpu.memory_space<vmem>>, vector<1x1x96xf32>
    %9 = vector.shape_cast %8 : vector<1x1x96xf32> to vector<1x96xf32>
    %10 = vector.broadcast %9 : vector<1x96xf32> to vector<8x96xf32>
    %11 = arith.addf %7, %10 : vector<8x96xf32>
    %12 = vector.extract_strided_slice %11 {offsets = [0, 0], sizes = [8, 16], strides = [1, 1]} : vector<8x96xf32> to vector<8x16xf32>
    %13 = vector.extract_strided_slice %11 {offsets = [0, 16], sizes = [8, 16], strides = [1, 1]} : vector<8x96xf32> to vector<8x16xf32>
    %14 = vector.extract_strided_slice %11 {offsets = [0, 32], sizes = [8, 16], strides = [1, 1]} : vector<8x96xf32> to vector<8x16xf32>
    %15 = vector.extract_strided_slice %11 {offsets = [0, 48], sizes = [8, 16], strides = [1, 1]} : vector<8x96xf32> to vector<8x16xf32>
    %16 = vector.extract_strided_slice %11 {offsets = [0, 64], sizes = [8, 16], strides = [1, 1]} : vector<8x96xf32> to vector<8x16xf32>
    %17 = vector.extract_strided_slice %11 {offsets = [0, 80], sizes = [8, 16], strides = [1, 1]} : vector<8x96xf32> to vector<8x16xf32>
    %18 = vector.shape_cast %12 : vector<8x16xf32> to vector<1x8x16xf32>
    %19 = vector.shape_cast %13 : vector<8x16xf32> to vector<1x8x16xf32>
    %20 = vector.shape_cast %14 : vector<8x16xf32> to vector<1x8x16xf32>
    %21 = vector.shape_cast %15 : vector<8x16xf32> to vector<1x8x16xf32>
    %22 = vector.shape_cast %16 : vector<8x16xf32> to vector<1x8x16xf32>
    %23 = vector.shape_cast %17 : vector<8x16xf32> to vector<1x8x16xf32>
    %24 = tpu.concatenate %18, %19, %20, %21, %22, %23 in 0 : vector<1x8x16xf32>, vector<1x8x16xf32>, vector<1x8x16xf32>, vector<1x8x16xf32>, vector<1x8x16xf32>, vector<1x8x16xf32> -> vector<6x8x16xf32>
    %25 = vector.extract_strided_slice %24 {offsets = [0, 0, 0], sizes = [2, 8, 16], strides = [1, 1, 1]} : vector<6x8x16xf32> to vector<2x8x16xf32>
    %26 = arith.truncf %25 : vector<2x8x16xf32> to vector<2x8x16xbf16>
    %27 = vector.extract_strided_slice %24 {offsets = [2, 0, 0], sizes = [2, 8, 16], strides = [1, 1, 1]} : vector<6x8x16xf32> to vector<2x8x16xf32>
    %28 = arith.truncf %27 : vector<2x8x16xf32> to vector<2x8x16xbf16>
    %29 = vector.extract_strided_slice %24 {offsets = [4, 0, 0], sizes = [2, 8, 16], strides = [1, 1, 1]} : vector<6x8x16xf32> to vector<2x8x16xf32>
    %30 = arith.truncf %29 : vector<2x8x16xf32> to vector<2x8x16xbf16>
    "tpu.trace_start"() <{level = 10 : i32, message = "hqd,hkd->hqk"}> : () -> ()
    %cst_8 = arith.constant dense<0.000000e+00> : vector<2x8x8xf32>
    %31 = tpu.matmul %26, %28, %cst_8 {dimension_numbers = #tpu.dot_dimension_numbers<[2], [2], [1], [1], [0, 0, 0, 1, 1, 1], [0], [0]>} : vector<2x8x16xbf16>, vector<2x8x16xbf16>, vector<2x8x8xf32> -> vector<2x8x8xf32>
    "tpu.trace_stop"() : () -> ()
    %c0_9 = arith.constant 0 : index
    %c0_10 = arith.constant 0 : index
    %c0_11 = arith.constant 0 : index
    %32 = vector.load %arg3[%c0_9, %c0_10, %c0_11] : memref<1x1x8xf32, #tpu.memory_space<vmem>>, vector<1x1x8xf32>
    %33 = vector.broadcast %32 : vector<1x1x8xf32> to vector<2x8x8xf32>
    %34 = arith.addf %31, %33 : vector<2x8x8xf32>
    %cst_12 = arith.constant dense<0xFF800000> : vector<2x8xf32>
    %35 = vector.multi_reduction <maximumf>, %34, %cst_12 [2] : vector<2x8x8xf32> to vector<2x8xf32>
    %36 = vector.shape_cast %35 : vector<2x8xf32> to vector<2x8x1xf32>
    %37 = vector.broadcast %36 : vector<2x8x1xf32> to vector<2x8x8xf32>
    %38 = arith.subf %34, %37 : vector<2x8x8xf32>
    %39 = math.exp %38 : vector<2x8x8xf32>
    %cst_13 = arith.constant dense<0.000000e+00> : vector<2x8xf32>
    %40 = vector.multi_reduction <add>, %39, %cst_13 [2] : vector<2x8x8xf32> to vector<2x8xf32>
    %41 = vector.shape_cast %40 : vector<2x8xf32> to vector<2x8x1xf32>
    %42 = tpu.reciprocal %41 {approx = true} : vector<2x8x1xf32> -> vector<2x8x1xf32>
    %43 = vector.broadcast %42 : vector<2x8x1xf32> to vector<2x8x8xf32>
    %44 = arith.mulf %39, %43 : vector<2x8x8xf32>
    %45 = arith.truncf %44 : vector<2x8x8xf32> to vector<2x8x8xbf16>
    "tpu.trace_start"() <{level = 10 : i32, message = "hqk,hkd->hqd"}> : () -> ()
    %cst_14 = arith.constant dense<0.000000e+00> : vector<2x8x16xf32>
    %46 = tpu.matmul %45, %30, %cst_14 {dimension_numbers = #tpu.dot_dimension_numbers<[2], [1], [1], [2], [0, 0, 0, 1, 1, 2], [0], [0]>} : vector<2x8x8xbf16>, vector<2x8x16xbf16>, vector<2x8x16xf32> -> vector<2x8x16xf32>
    "tpu.trace_stop"() : () -> ()
    %47 = arith.truncf %46 : vector<2x8x16xf32> to vector<2x8x16xbf16>
    %c0_15 = arith.constant 0 : index
    %c0_16 = arith.constant 0 : index
    %c0_17 = arith.constant 0 : index
    %c0_18 = arith.constant 0 : index
    %48 = vector.load %arg8[%c0_15, %c0_16, %c0_17, %c0_18] : memref<1x2x16x32xbf16, #tpu.memory_space<vmem>>, vector<1x2x16x32xbf16>
    %49 = vector.shape_cast %48 : vector<1x2x16x32xbf16> to vector<2x16x32xbf16>
    "tpu.trace_start"() <{level = 10 : i32, message = "hqd,hdo->hqo"}> : () -> ()
    %cst_19 = arith.constant dense<0.000000e+00> : vector<2x8x32xf32>
    %50 = tpu.matmul %47, %49, %cst_19 {dimension_numbers = #tpu.dot_dimension_numbers<[2], [1], [1], [2], [0, 0, 0, 1, 1, 2], [0], [0]>} : vector<2x8x16xbf16>, vector<2x16x32xbf16>, vector<2x8x32xf32> -> vector<2x8x32xf32>
    "tpu.trace_stop"() : () -> ()
    %cst_20 = arith.constant dense<0.000000e+00> : vector<8x32xf32>
    %51 = vector.multi_reduction <add>, %50, %cst_20 [0] : vector<2x8x32xf32> to vector<8x32xf32>
    %c0_21 = arith.constant 0 : index
    %c0_22 = arith.constant 0 : index
    %c0_23 = arith.constant 0 : index
    %52 = vector.load %arg9[%c0_21, %c0_22, %c0_23] : memref<1x1x32xf32, #tpu.memory_space<vmem>>, vector<1x1x32xf32>
    %53 = vector.shape_cast %52 : vector<1x1x32xf32> to vector<1x32xf32>
    %54 = vector.broadcast %53 : vector<1x32xf32> to vector<8x32xf32>
    %55 = arith.addf %51, %54 : vector<8x32xf32>
    %56 = arith.addf %3, %55 : vector<8x32xf32>
    %c0_24 = arith.constant 0 : index
    %c0_25 = arith.constant 0 : index
    %c0_26 = arith.constant 0 : index
    %57 = vector.load %arg10[%c0_24, %c0_25, %c0_26] : memref<1x1x32xf32, #tpu.memory_space<vmem>>, vector<1x1x32xf32>
    %58 = vector.shape_cast %57 : vector<1x1x32xf32> to vector<1x32xf32>
    %c0_27 = arith.constant 0 : index
    %c0_28 = arith.constant 0 : index
    %c0_29 = arith.constant 0 : index
    %59 = vector.load %arg11[%c0_27, %c0_28, %c0_29] : memref<1x1x32xf32, #tpu.memory_space<vmem>>, vector<1x1x32xf32>
    %60 = vector.shape_cast %59 : vector<1x1x32xf32> to vector<1x32xf32>
    %cst_30 = arith.constant dense<0.000000e+00> : vector<8xf32>
    %61 = vector.multi_reduction <add>, %56, %cst_30 [1] : vector<8x32xf32> to vector<8xf32>
    %62 = vector.shape_cast %61 : vector<8xf32> to vector<8x1xf32>
    %cst_31 = arith.constant 3.200000e+01 : f32
    %63 = vector.broadcast %cst_31 : f32 to vector<8x1xf32>
    %64 = arith.divf %62, %63 : vector<8x1xf32>
    %65 = vector.broadcast %64 : vector<8x1xf32> to vector<8x32xf32>
    %66 = arith.subf %56, %65 : vector<8x32xf32>
    %67 = arith.mulf %66, %66 : vector<8x32xf32>
    %cst_32 = arith.constant dense<0.000000e+00> : vector<8xf32>
    %68 = vector.multi_reduction <add>, %67, %cst_32 [1] : vector<8x32xf32> to vector<8xf32>
    %69 = vector.shape_cast %68 : vector<8xf32> to vector<8x1xf32>
    %cst_33 = arith.constant 3.200000e+01 : f32
    %70 = vector.broadcast %cst_33 : f32 to vector<8x1xf32>
    %71 = arith.divf %69, %70 : vector<8x1xf32>
    %72 = vector.broadcast %64 : vector<8x1xf32> to vector<8x32xf32>
    %73 = arith.subf %56, %72 : vector<8x32xf32>
    %cst_34 = arith.constant 9.99999996E-13 : f32
    %74 = vector.broadcast %cst_34 : f32 to vector<8x1xf32>
    %75 = arith.addf %71, %74 : vector<8x1xf32>
    %76 = math.rsqrt %75 : vector<8x1xf32>
    %77 = vector.broadcast %76 : vector<8x1xf32> to vector<8x32xf32>
    %78 = arith.mulf %73, %77 : vector<8x32xf32>
    %79 = vector.broadcast %58 : vector<1x32xf32> to vector<8x32xf32>
    %80 = arith.mulf %78, %79 : vector<8x32xf32>
    %81 = vector.broadcast %60 : vector<1x32xf32> to vector<8x32xf32>
    %82 = arith.addf %80, %81 : vector<8x32xf32>
    %83 = arith.truncf %82 : vector<8x32xf32> to vector<8x32xbf16>
    %c0_35 = arith.constant 0 : index
    %c0_36 = arith.constant 0 : index
    %c0_37 = arith.constant 0 : index
    %84 = vector.load %arg12[%c0_35, %c0_36, %c0_37] : memref<1x32x64xbf16, #tpu.memory_space<vmem>>, vector<1x32x64xbf16>
    %85 = vector.shape_cast %84 : vector<1x32x64xbf16> to vector<32x64xbf16>
    %cst_38 = arith.constant dense<0.000000e+00> : vector<8x64xf32>
    %86 = tpu.matmul %83, %85, %cst_38 {dimension_numbers = #tpu.dot_dimension_numbers<[1], [0], [0], [1], [0, 0, 1, 1], [], []>} : vector<8x32xbf16>, vector<32x64xbf16>, vector<8x64xf32> -> vector<8x64xf32>
    %c0_39 = arith.constant 0 : index
    %c0_40 = arith.constant 0 : index
    %c0_41 = arith.constant 0 : index
    %87 = vector.load %arg13[%c0_39, %c0_40, %c0_41] : memref<1x1x64xf32, #tpu.memory_space<vmem>>, vector<1x1x64xf32>
    %88 = vector.shape_cast %87 : vector<1x1x64xf32> to vector<1x64xf32>
    %89 = vector.broadcast %88 : vector<1x64xf32> to vector<8x64xf32>
    %90 = arith.addf %86, %89 : vector<8x64xf32>
    %cst_42 = arith.constant 5.000000e-01 : f32
    %91 = vector.broadcast %cst_42 : f32 to vector<8x64xf32>
    %92 = arith.mulf %91, %90 : vector<8x64xf32>
    %cst_43 = arith.constant 4.471500e-02 : f32
    %93 = vector.broadcast %cst_43 : f32 to vector<8x64xf32>
    %94 = arith.mulf %93, %90 : vector<8x64xf32>
    %95 = arith.mulf %94, %90 : vector<8x64xf32>
    %96 = arith.mulf %95, %90 : vector<8x64xf32>
    %97 = arith.addf %90, %96 : vector<8x64xf32>
    %cst_44 = arith.constant 0.797884583 : f32
    %98 = vector.broadcast %cst_44 : f32 to vector<8x64xf32>
    %99 = arith.mulf %98, %97 : vector<8x64xf32>
    %100 = math.tanh %99 : vector<8x64xf32>
    %cst_45 = arith.constant 1.000000e+00 : f32
    %101 = vector.broadcast %cst_45 : f32 to vector<8x64xf32>
    %102 = arith.addf %101, %100 : vector<8x64xf32>
    %103 = arith.mulf %92, %102 : vector<8x64xf32>
    %104 = arith.truncf %103 : vector<8x64xf32> to vector<8x64xbf16>
    %c0_46 = arith.constant 0 : index
    %c0_47 = arith.constant 0 : index
    %c0_48 = arith.constant 0 : index
    %105 = vector.load %arg14[%c0_46, %c0_47, %c0_48] : memref<1x64x32xbf16, #tpu.memory_space<vmem>>, vector<1x64x32xbf16>
    %106 = vector.shape_cast %105 : vector<1x64x32xbf16> to vector<64x32xbf16>
    %cst_49 = arith.constant dense<0.000000e+00> : vector<8x32xf32>
    %107 = tpu.matmul %104, %106, %cst_49 {dimension_numbers = #tpu.dot_dimension_numbers<[1], [0], [0], [1], [0, 0, 1, 1], [], []>} : vector<8x64xbf16>, vector<64x32xbf16>, vector<8x32xf32> -> vector<8x32xf32>
    %c0_50 = arith.constant 0 : index
    %c0_51 = arith.constant 0 : index
    %c0_52 = arith.constant 0 : index
    %108 = vector.load %arg15[%c0_50, %c0_51, %c0_52] : memref<1x1x32xf32, #tpu.memory_space<vmem>>, vector<1x1x32xf32>
    %109 = vector.shape_cast %108 : vector<1x1x32xf32> to vector<1x32xf32>
    %110 = vector.broadcast %109 : vector<1x32xf32> to vector<8x32xf32>
    %111 = arith.addf %107, %110 : vector<8x32xf32>
    %112 = arith.addf %82, %111 : vector<8x32xf32>
    %c0_53 = arith.constant 0 : index
    %c0_54 = arith.constant 0 : index
    %c0_55 = arith.constant 0 : index
    %113 = vector.load %arg16[%c0_53, %c0_54, %c0_55] : memref<1x1x32xf32, #tpu.memory_space<vmem>>, vector<1x1x32xf32>
    %114 = vector.shape_cast %113 : vector<1x1x32xf32> to vector<1x32xf32>
    %c0_56 = arith.constant 0 : index
    %c0_57 = arith.constant 0 : index
    %c0_58 = arith.constant 0 : index
    %115 = vector.load %arg17[%c0_56, %c0_57, %c0_58] : memref<1x1x32xf32, #tpu.memory_space<vmem>>, vector<1x1x32xf32>
    %116 = vector.shape_cast %115 : vector<1x1x32xf32> to vector<1x32xf32>
    %cst_59 = arith.constant dense<0.000000e+00> : vector<8xf32>
    %117 = vector.multi_reduction <add>, %112, %cst_59 [1] : vector<8x32xf32> to vector<8xf32>
    %118 = vector.shape_cast %117 : vector<8xf32> to vector<8x1xf32>
    %cst_60 = arith.constant 3.200000e+01 : f32
    %119 = vector.broadcast %cst_60 : f32 to vector<8x1xf32>
    %120 = arith.divf %118, %119 : vector<8x1xf32>
    %121 = vector.broadcast %120 : vector<8x1xf32> to vector<8x32xf32>
    %122 = arith.subf %112, %121 : vector<8x32xf32>
    %123 = arith.mulf %122, %122 : vector<8x32xf32>
    %cst_61 = arith.constant dense<0.000000e+00> : vector<8xf32>
    %124 = vector.multi_reduction <add>, %123, %cst_61 [1] : vector<8x32xf32> to vector<8xf32>
    %125 = vector.shape_cast %124 : vector<8xf32> to vector<8x1xf32>
    %cst_62 = arith.constant 3.200000e+01 : f32
    %126 = vector.broadcast %cst_62 : f32 to vector<8x1xf32>
    %127 = arith.divf %125, %126 : vector<8x1xf32>
    %128 = vector.broadcast %120 : vector<8x1xf32> to vector<8x32xf32>
    %129 = arith.subf %112, %128 : vector<8x32xf32>
    %cst_63 = arith.constant 9.99999996E-13 : f32
    %130 = vector.broadcast %cst_63 : f32 to vector<8x1xf32>
    %131 = arith.addf %127, %130 : vector<8x1xf32>
    %132 = math.rsqrt %131 : vector<8x1xf32>
    %133 = vector.broadcast %132 : vector<8x1xf32> to vector<8x32xf32>
    %134 = arith.mulf %129, %133 : vector<8x32xf32>
    %135 = vector.broadcast %114 : vector<1x32xf32> to vector<8x32xf32>
    %136 = arith.mulf %134, %135 : vector<8x32xf32>
    %137 = vector.broadcast %116 : vector<1x32xf32> to vector<8x32xf32>
    %138 = arith.addf %136, %137 : vector<8x32xf32>
    %c0_64 = arith.constant 0 : index
    %c0_65 = arith.constant 0 : index
    %139 = vector.load %arg23[%c0_64, %c0_65] : memref<8x32xf32, #tpu.memory_space<vmem>>, vector<8x32xf32>
    tpu.vector_store %arg23[%c0_64, %c0_65], %138 {strides = array<i32>} : memref<8x32xf32, #tpu.memory_space<vmem>>, vector<8x32xf32>,
    %c1_i32 = arith.constant 1 : i32
    %140 = arith.cmpi eq, %arg1, %c1_i32 : i32
    %141 = arith.extui %140 : i1 to i32
    %c0_i32_66 = arith.constant 0 : i32
    %142 = arith.cmpi ne, %141, %c0_i32_66 : i32
    scf.if %142 {
      %143 = vector.extract_strided_slice %138 {offsets = [0, 0], sizes = [1, 32], strides = [1, 1]} : vector<8x32xf32> to vector<1x32xf32>
      %144 = arith.truncf %143 : vector<1x32xf32> to vector<1x32xbf16>
      %c0_67 = arith.constant 0 : index
      %c0_68 = arith.constant 0 : index
      %145 = vector.load %arg18[%c0_67, %c0_68] : memref<32x32xbf16, #tpu.memory_space<vmem>>, vector<32x32xbf16>
      %cst_69 = arith.constant dense<0.000000e+00> : vector<1x32xf32>
      %146 = tpu.matmul %144, %145, %cst_69 {dimension_numbers = #tpu.dot_dimension_numbers<[1], [0], [0], [1], [0, 0, 1, 1], [], []>} : vector<1x32xbf16>, vector<32x32xbf16>, vector<1x32xf32> -> vector<1x32xf32>
      %c0_70 = arith.constant 0 : index
      %c0_71 = arith.constant 0 : index
      %147 = vector.load %arg19[%c0_70, %c0_71] : memref<1x32xf32, #tpu.memory_space<vmem>>, vector<1x32xf32>
      %148 = arith.addf %146, %147 : vector<1x32xf32>
      %149 = math.tanh %148 : vector<1x32xf32>
      %150 = arith.truncf %149 : vector<1x32xf32> to vector<1x32xbf16>
      %c0_72 = arith.constant 0 : index
      %c0_73 = arith.constant 0 : index
      %151 = vector.load %arg20[%c0_72, %c0_73] : memref<32x128xbf16, #tpu.memory_space<vmem>>, vector<32x128xbf16>
      %cst_74 = arith.constant dense<0.000000e+00> : vector<1x128xf32>
      %152 = tpu.matmul %150, %151, %cst_74 {dimension_numbers = #tpu.dot_dimension_numbers<[1], [0], [0], [1], [0, 0, 1, 1], [], []>} : vector<1x32xbf16>, vector<32x128xbf16>, vector<1x128xf32> -> vector<1x128xf32>
      %c0_75 = arith.constant 0 : index
      %c0_76 = arith.constant 0 : index
      %153 = vector.load %arg21[%c0_75, %c0_76] : memref<1x128xf32, #tpu.memory_space<vmem>>, vector<1x128xf32>
      %154 = arith.addf %152, %153 : vector<1x128xf32>
      %c0_77 = arith.constant 0 : index
      %c0_78 = arith.constant 0 : index
      %c0_79 = arith.constant 0 : index
      %155 = vector.load %arg22[%c0_77, %c0_78, %c0_79] : memref<1x1x128xf32, #tpu.memory_space<vmem>>, vector<1x1x128xf32>
      %156 = vector.shape_cast %155 : vector<1x1x128xf32> to vector<1x128xf32>
      %157 = vector.shape_cast %154 : vector<1x128xf32> to vector<1x1x128xf32>
      tpu.vector_store %arg22[%c0_77, %c0_78, %c0_79], %157 {strides = array<i32>} : memref<1x1x128xf32, #tpu.memory_space<vmem>>, vector<1x1x128xf32>,
    } else {
    }
    return
  }
  func.func @transform_0(%arg0: i32, %arg1: i32) -> (i32, i32, i32) {
    %c0_i32 = arith.constant 0 : i32
    %c0_i32_0 = arith.constant 0 : i32
    %c0_i32_1 = arith.constant 0 : i32
    return %arg0, %c0_i32, %c0_i32_0 : i32, i32, i32
  }
  func.func @transform_1(%arg0: i32, %arg1: i32) -> (i32, i32, i32) {
    %c0_i32 = arith.constant 0 : i32
    %c0_i32_0 = arith.constant 0 : i32
    %c0_i32_1 = arith.constant 0 : i32
    return %arg0, %c0_i32, %c0_i32_0 : i32, i32, i32
  }
  func.func @transform_2(%arg0: i32, %arg1: i32) -> (i32, i32) {
    %c0_i32 = arith.constant 0 : i32
    %c0_i32_0 = arith.constant 0 : i32
    %c0_i32_1 = arith.constant 0 : i32
    return %c0_i32, %c0_i32_0 : i32, i32
  }
  func.func @transform_3(%arg0: i32, %arg1: i32) -> (i32, i32) {
    %c0_i32 = arith.constant 0 : i32
    %c0_i32_0 = arith.constant 0 : i32
    %c0_i32_1 = arith.constant 0 : i32
    return %c0_i32, %c0_i32_0 : i32, i32
  }
  func.func @transform_4(%arg0: i32, %arg1: i32) -> (i32, i32, i32) {
    %c0_i32 = arith.constant 0 : i32
    %c0_i32_0 = arith.constant 0 : i32
    %c0_i32_1 = arith.constant 0 : i32
    return %arg1, %c0_i32, %c0_i32_0 : i32, i32, i32
  }
  func.func @transform_5(%arg0: i32, %arg1: i32) -> (i32, i32, i32) {
    %c0_i32 = arith.constant 0 : i32
    %c0_i32_0 = arith.constant 0 : i32
    %c0_i32_1 = arith.constant 0 : i32
    return %arg1, %c0_i32, %c0_i32_0 : i32, i32, i32
  }
  func.func @transform_6(%arg0: i32, %arg1: i32) -> (i32, i32, i32, i32) {
    %c0_i32 = arith.constant 0 : i32
    %c0_i32_0 = arith.constant 0 : i32
    %c0_i32_1 = arith.constant 0 : i32
    %c0_i32_2 = arith.constant 0 : i32
    return %arg1, %c0_i32, %c0_i32_0, %c0_i32_1 : i32, i32, i32, i32
  }
  func.func @transform_7(%arg0: i32, %arg1: i32) -> (i32, i32, i32) {
    %c0_i32 = arith.constant 0 : i32
    %c0_i32_0 = arith.constant 0 : i32
    %c0_i32_1 = arith.constant 0 : i32
    return %arg1, %c0_i32, %c0_i32_0 : i32, i32, i32
  }
  func.func @transform_8(%arg0: i32, %arg1: i32) -> (i32, i32, i32) {
    %c0_i32 = arith.constant 0 : i32
    %c0_i32_0 = arith.constant 0 : i32
    %c0_i32_1 = arith.constant 0 : i32
    return %arg1, %c0_i32, %c0_i32_0 : i32, i32, i32
  }
  func.func @transform_9(%arg0: i32, %arg1: i32) -> (i32, i32, i32) {
    %c0_i32 = arith.constant 0 : i32
    %c0_i32_0 = arith.constant 0 : i32
    %c0_i32_1 = arith.constant 0 : i32
    return %arg1, %c0_i32, %c0_i32_0 : i32, i32, i32
  }
  func.func @transform_10(%arg0: i32, %arg1: i32) -> (i32, i32, i32) {
    %c0_i32 = arith.constant 0 : i32
    %c0_i32_0 = arith.constant 0 : i32
    %c0_i32_1 = arith.constant 0 : i32
    return %arg1, %c0_i32, %c0_i32_0 : i32, i32, i32
  }
  func.func @transform_11(%arg0: i32, %arg1: i32) -> (i32, i32, i32) {
    %c0_i32 = arith.constant 0 : i32
    %c0_i32_0 = arith.constant 0 : i32
    %c0_i32_1 = arith.constant 0 : i32
    return %arg1, %c0_i32, %c0_i32_0 : i32, i32, i32
  }
  func.func @transform_12(%arg0: i32, %arg1: i32) -> (i32, i32, i32) {
    %c0_i32 = arith.constant 0 : i32
    %c0_i32_0 = arith.constant 0 : i32
    %c0_i32_1 = arith.constant 0 : i32
    return %arg1, %c0_i32, %c0_i32_0 : i32, i32, i32
  }
  func.func @transform_13(%arg0: i32, %arg1: i32) -> (i32, i32, i32) {
    %c0_i32 = arith.constant 0 : i32
    %c0_i32_0 = arith.constant 0 : i32
    %c0_i32_1 = arith.constant 0 : i32
    return %arg1, %c0_i32, %c0_i32_0 : i32, i32, i32
  }
  func.func @transform_14(%arg0: i32, %arg1: i32) -> (i32, i32, i32) {
    %c0_i32 = arith.constant 0 : i32
    %c0_i32_0 = arith.constant 0 : i32
    %c0_i32_1 = arith.constant 0 : i32
    return %arg1, %c0_i32, %c0_i32_0 : i32, i32, i32
  }
  func.func @transform_15(%arg0: i32, %arg1: i32) -> (i32, i32, i32) {
    %c0_i32 = arith.constant 0 : i32
    %c0_i32_0 = arith.constant 0 : i32
    %c0_i32_1 = arith.constant 0 : i32
    return %arg1, %c0_i32, %c0_i32_0 : i32, i32, i32
  }
  func.func @transform_16(%arg0: i32, %arg1: i32) -> (i32, i32) {
    %c0_i32 = arith.constant 0 : i32
    %c0_i32_0 = arith.constant 0 : i32
    %c0_i32_1 = arith.constant 0 : i32
    return %c0_i32, %c0_i32_0 : i32, i32
  }
  func.func @transform_17(%arg0: i32, %arg1: i32) -> (i32, i32) {
    %c0_i32 = arith.constant 0 : i32
    %c0_i32_0 = arith.constant 0 : i32
    %c0_i32_1 = arith.constant 0 : i32
    return %c0_i32, %c0_i32_0 : i32, i32
  }
  func.func @transform_18(%arg0: i32, %arg1: i32) -> (i32, i32) {
    %c0_i32 = arith.constant 0 : i32
    %c0_i32_0 = arith.constant 0 : i32
    %c0_i32_1 = arith.constant 0 : i32
    return %c0_i32, %c0_i32_0 : i32, i32
  }
  func.func @transform_19(%arg0: i32, %arg1: i32) -> (i32, i32) {
    %c0_i32 = arith.constant 0 : i32
    %c0_i32_0 = arith.constant 0 : i32
    %c0_i32_1 = arith.constant 0 : i32
    return %c0_i32, %c0_i32_0 : i32, i32
  }
  func.func @transform_20(%arg0: i32, %arg1: i32) -> (i32, i32, i32) {
    %c0_i32 = arith.constant 0 : i32
    %c0_i32_0 = arith.constant 0 : i32
    %c0_i32_1 = arith.constant 0 : i32
    return %arg0, %c0_i32, %c0_i32_0 : i32, i32, i32
  }
}

</mosaic_0001>

<bundles_post_ra>
// kernel: charbert_classifier.1
= control target key start
LH: loop header
LB: loop body
LE: loop exit
PB: predicated region body
PF: predicated region fallthrough
CT: control target
= control target key end

     0   :  { %s2301_s0 = inlined_call_operand.vmem [shape: f32[2,8,32], index: 0, kind: input, shape index: {}]   ;;  %s2302_s1 = inlined_call_operand.vmem [shape: f32[2,1,8], index: 1, kind: input, shape index: {}]   ;;  %s2303_s2 = inlined_call_operand.vmem [shape: f32[1,32], index: 2, kind: input, shape index: {}]   ;;  %s2304_s3 = inlined_call_operand.vmem [shape: f32[1,32], index: 3, kind: input, shape index: {}]   ;;  %s2305_s4 = inlined_call_operand.vmem [shape: bf16[2,32,96], index: 4, kind: input, shape index: {}]   ;;  %s2306_s5 = inlined_call_operand.vmem [shape: f32[2,1,96], index: 5, kind: input, shape index: {}]   ;;  %s2307_s6 = inlined_call_operand.vmem [shape: bf16[2,2,16,32], index: 6, kind: input, shape index: {}]   ;;  %s2308_s7 = inlined_call_operand.vmem [shape: f32[2,1,32], index: 7, kind: input, shape index: {}]   ;;  %s2309_s8 = inlined_call_operand.vmem [shape: f32[2,1,32], index: 8, kind: input, shape index: {}]   ;;  %s2310_s9 = inlined_call_operand.vmem [shape: f32[2,1,32], index: 9, kind: input, shape index: {}]   ;;  %s2311_s10 = inlined_call_operand.vmem [shape: bf16[2,32,64], index: 10, kind: input, shape index: {}]   ;;  %s2312_s11 = inlined_call_operand.vmem [shape: f32[2,1,64], index: 11, kind: input, shape index: {}]   ;;  %s2313_s12 = inlined_call_operand.vmem [shape: bf16[2,64,32], index: 12, kind: input, shape index: {}]   ;;  %s2314_s13 = inlined_call_operand.vmem [shape: f32[2,1,32], index: 13, kind: input, shape index: {}]   ;;  %s2315_s14 = inlined_call_operand.vmem [shape: f32[2,1,32], index: 14, kind: input, shape index: {}]   ;;  %s2316_s15 = inlined_call_operand.vmem [shape: f32[2,1,32], index: 15, kind: input, shape index: {}]   ;;  %s2317_s16 = inlined_call_operand.vmem [shape: bf16[32,32], index: 16, kind: input, shape index: {}]   ;;  %s2318_s17 = inlined_call_operand.vmem [shape: f32[1,32], index: 17, kind: input, shape index: {}]   ;;  %s2319_s18 = inlined_call_operand.vmem [shape: bf16[32,128], index: 18, kind: input, shape index: {}]   ;;  %s2320_s19 = inlined_call_operand.vmem [shape: f32[1,128], index: 19, kind: input, shape index: {}]   ;;  %s2321_s20 = inlined_call_operand.hbm [shape: f32[2,1,128], index: 20, kind: output, shape index: {}]  }
   0x1   :  { %2337 = sst [smem:[#allocation18_spill]] %s2301_s0 }
   0x2   :  { %2338 = sst [smem:[#allocation19_spill]] %s2302_s1 }
   0x3   :  { %2339 = sst [smem:[#allocation20_spill]] %s2303_s2 }
   0x4   :  { %2340 = sst [smem:[#allocation21_spill]] %s2304_s3 }
   0x5   :  { %2341 = sst [smem:[#allocation22_spill]] %s2305_s4 }
   0x6   :  { %2342 = sst [smem:[#allocation23_spill]] %s2307_s6 }
   0x7   :  { %2343 = sst [smem:[#allocation24_spill]] %s2310_s9 }
   0x8   :  { %2344 = sst [smem:[#allocation25_spill]] %s2311_s10 }
   0x9   :  { %2345 = sst [smem:[#allocation26_spill]] %s2315_s14 }
   0xa   :  { %2346 = sst [smem:[#allocation27_spill]] %s2316_s15 }
   0xb   :  { %2347 = sst [smem:[#allocation28_spill]] %s2317_s16 }
   0xc   :  { %2348 = sst [smem:[#allocation29_spill]] %s2318_s17 }
   0xd   :  { %2349 = sst [smem:[#allocation30_spill]] %s2319_s18 }
   0xe   :  { %2350 = sst [smem:[#allocation31_spill]] %s2320_s19 }
   0xf   :  { %2351 = sst [smem:[#allocation32_spill]] %s2321_s20 }
  0x10   :  { %25 = vsyncpa [#allocation4], 0 }
  0x11   :  { %27 = vsyncpa [#allocation4 + $0x1], 0  ;;  %s1993_s1 = smov 0   ;;  %s1995_s22 = smov 0  }
  0x12   :  { %s1997_s23 = smov 0   ;;  %s1999_s24 = smov 0  }
  0x13   :  { %s2001_s2 = smov 0   ;;  %s2003_s25 = smov 0  }
  0x14   :  { %s2005_s3 = smov 0   ;;  %s2007_s26 = smov 0  }
  0x15 LB: > { %2352 = sst [smem:[#allocation6_spill]] %s1851_s1  ;;  %s1571_s27 = sadd.s32 4294967295, %s1879_s26   ;;  %s1879_s26 = sphi %s2007_s26, %s33_s26   ;;  %s1875_s3 = sphi %s2005_s3, %s2405_s3   ;;  %s1871_s25 = sphi %s2003_s25, %s2404_s25   ;;  %s1867_s2 = sphi %s2001_s2, %s2403_s2   ;;  %s1863_s24 = sphi %s1999_s24, %s2402_s24   ;;  %s1859_s23 = sphi %s1997_s23, %s2408_s23   ;;  %s1855_s22 = sphi %s1995_s22, %s2407_s22   ;;  %s1851_s1 = sphi %s1993_s1, %s2406_s1  }
  0x16   : > { %2353 = sst [smem:[#allocation7_spill]] %s1859_s23  ;;  %s1572_s28 = sadd.s32 4294967294, %s1879_s26  }
  0x17   : > { %2354 = sst [smem:[#allocation8_spill]] %s1863_s24  ;;  %s42_s4 = sadd.s32 1, %s1871_s25 }
  0x18   : > { %2355 = sst [smem:[#allocation9_spill]] %s1867_s2  ;;  %p43_p0 = scmp.ge.s32.totalorder %s42_s4, 2 }
  0x19   : > { %2356 = sst [smem:[#allocation10_spill]] %s1871_s25  ;;  %s45_s29 = sadd.s32 1, %s1875_s3 }
  0x1a   : > { %2357 = sst [smem:[#allocation11_spill]] %s1875_s3  ;;  %p552_p1 = scmp.ne.s32.totalorder %s1859_s23, %s1855_s22 }
  0x1b   : > { %2358 = sst [smem:[#allocation12_spill]] %s1879_s26  ;;  %p553_p2 = scmp.eq.s32.totalorder %s1571_s27, 3 }
  0x1c   : > { %s2410_s4 = smov (%p43_p0, %s42_s4), 0  ;;  %s2412_s29 = smov (!%p43_p0, %s45_s29), %s1875_s3 }
  0x1d   : > { %2359 = sst [smem:[#allocation13_spill]] %s2410_s4  ;;  %p2042_p3 = por %p553_p2, %p552_p1 }
  0x1e   : > { %p558_p4 = scmp.ne.s32.totalorder %s1855_s22, %s1851_s1  ;;  %p47_p5 = scmp.ge.s32.totalorder %s2412_s29, 2 }
  0x1f   : > { %s2360_s30 = scalar_select %p2042_p3, 1, 0 }
  0x20   : > { %p559_p6 = scmp.eq.s32.totalorder %s1572_s28, 3  ;;  %p1575_p7 = scmp.ge.s32.totalorder %s1879_s26, 1 }
  0x21   : > { %2361 = sst [smem:[#allocation14_spill]] %s2360_s30  ;;  %p688_p8 = scmp.lt.s32.totalorder %s1879_s26, 5 }
  0x22   : > { %s2414_s29 = smov (%p47_p5, %s2412_s29), 0  ;;  %p2052_p9 = por %p559_p6, %p558_p4 }
  0x23   : > { %2362 = sst [smem:[#allocation15_spill]] %s2414_s29  ;;  %p689_p10 = pnand %p1575_p7, %p688_p8 }
  0x24   : > { %s2363_s0 = scalar_select %p2052_p9, 1, 0 }
  0x25   : > { %s539_s21 = ssub.s32 %s1875_s3, %s2414_s29  ;;  %s542_s27 = sadd.s32 1, %s1859_s23 }
  0x26   : > { %2364 = sst [smem:[#allocation16_spill]] %s2363_s0  ;;  %p540_p11 = scmp.eq.s32.totalorder %s539_s21, 0 }
  0x27   : > { %692 = sbr.rel (%p689_p10) target bundleno = 2394 (0x95a), region = 100  ;;  %p791_p12 = scmp.lt.s32.totalorder (!%p689_p10), %s1867_s2, 1 }
  0x28   : > { %s2060_s4 = scalar_select %p540_p11, %s1859_s23, %s542_s27  }
  0x29   : > { %p798_p13 = scmp.lt.s32.totalorder (!%p689_p10), %s1863_s24, 1  ;;  %s2367_s1 = sld [smem:[#allocation18_spill]] (!%p689_p10) }
  0x2a   : > { %2365 = sst [smem:[#allocation17_spill]] %s2060_s4  ;;  %s2374_s14 = sand.u32 (!%p689_p10), 1, %s1855_s22  }
  0x2b   : > { %s2368_s19 = sld [smem:[#allocation22_spill]] (!%p689_p10)  ;;  %s2135_s15 = scalar_lea.vmem (!%p689_p10), [#allocation3], %s2374_s14 }
  0x2c   : > { %s2066_s25 = scalar_select %p791_p12, %s1867_s2, 1 }
  0x2d   : > { %s2069_s0 = scalar_select %p798_p13, %s1863_s24, 1 }
  0x2e   : > { %s1576_s21 = sshll.u32 %s2066_s25, 3  ;;  %s2369_s6 = sld [smem:[#allocation23_spill]] }
  0x2f   : > { %s794_s26 = scalar_lea.vmem %s2367_s1, %s1576_s21  ;;  %s1656_s30 = sshll.u32 %s2069_s0, 4 }
  0x30   : > { %s2371_s10 = sld [smem:[#allocation25_spill]]  ;;  %s835_s23 = scalar_lea.vmem %s2314_s13, %s2069_s0 }
  0x31   : > { %s2083_s17 = scalar_lea.vmem %s2368_s19, %s1656_s30  ;;  %s2372_s2 = sld [smem:[#allocation26_spill]] }
  0x32   : > { %s2375_s24 = sld [smem:[#allocation8_spill]] }
  0x34   : > { %s2092_s28 = scalar_lea.vmem %s2369_s6, %s1656_s30  ;;  %s1659_s6 = sshll.u32 %s2069_s0, 5 }
  0x35   : > { %s2123_s21 = scalar_lea.vmem %s2313_s12, %s1659_s6 }
  0x36   : > { %s2109_s18 = scalar_lea.vmem %s2371_s10, %s1656_s30  ;;  %s2373_s10 = sld [smem:[#allocation27_spill]] }
  0x37   : > { %s838_s3 = scalar_lea.vmem %s2372_s2, %s2069_s0 }
  0x38   : > { %p1585_p0 = scmp.ne.s32.totalorder %s2375_s24, 0 }
  0x39   : > { %s2376_s24 = sld [smem:[#allocation20_spill]] (!%p1585_p0) }
  0x3a   : > { %846 = sbr.rel (%p1585_p0) target bundleno = 333 (0x14d), region = 104  ;;  %s2377_s29 = sld [smem:[#allocation21_spill]] (!%p1585_p0) }
  0x3c   : > { %s841_s9 = scalar_lea.vmem %s2373_s10, %s2069_s0 }
  0x3f   : > { %v847_v0 = vld [vmem:[%s794_s26] sm:$0xff]  ;;  %vm850_vm0 = vcmask 261120   ;;  %v1881_v2 = vmov 32.0  }
  0x40   : > { %v851_v1 = vsel %vm850_vm0, %v847_v0, 0.0  ;;  %1754 = vrcp.f32 %v1881_v2  ;;  %v1752_v23 = vld [vmem:[%s2376_s24] ss:$0 sm:$0xff] }
  0x41   : > { %852 = vadd.xlane.f32.xlu0 %v851_v1  ;;  %v1753_v25 = vld [vmem:[%s2377_s29] ss:$0 sm:$0xff] }
  0x46   : > { %v1755_v3 = vpop.eup %1754 }
  0x47   : > { %v855_v4 = vmul.f32 32.0, %v1755_v3  ;;  %vm859_vm1 = vweird.f32 %v1755_v3 }
  0x49   : > { %v856_v5 = vsub.f32 1.0, %v855_v4 }
  0x4b   : > { %v857_v6 = vmul.f32 %v1755_v3, %v856_v5 }
  0x4d   : > { %v858_v7 = vadd.f32 %v1755_v3, %v857_v6 }
  0x4f   : > { %v860_v8 = vsel %vm859_vm1, %v1755_v3, %v858_v7 }
  0xb4   : > { %v853_v9 = vpop.xlane.xlu0 %852 }
  0xb5   : > { %v861_v10 = vmul.f32 %v860_v8, %v853_v9 }
  0xb7   : > { %v862_v11 = vsub.f32 %v847_v0, %v861_v10 }
  0xb9   : > { %v863_v12 = vmul.f32 %v862_v11, %v862_v11 }
  0xbb   : > { %v864_v13 = vsel %vm850_vm0, %v863_v12, 0.0 }
  0xbc   : > { %865 = vadd.xlane.f32.xlu0 %v864_v13 }
 0x12f   : > { %v866_v14 = vpop.xlane.xlu0 %865 }
 0x130   : > { %v867_v15 = vmul.f32 %v866_v14, %v860_v8 }
 0x132   : > { %v868_v16 = vadd.f32 1e-12, %v867_v15 }
 0x134   : > { %1756 = vrsqrt.f32 %v868_v16  ;;  %vm875_vm3 = vweird.f32 %v868_v16 }
 0x13a   : > { %v1757_v17 = vpop.eup %1756 }
 0x13b   : > { %v870_v18 = vmul.f32 %v1757_v17, %v868_v16  ;;  %vm876_vm2 = vweird.f32 %v1757_v17 }
 0x13c   : > { %vm877_vm4 = vmor %vm875_vm3, %vm876_vm2 }
 0x13d   : > { %v871_v19 = vmul.f32 %v1757_v17, %v870_v18 }
 0x13f   : > { %v872_v20 = vmul.f32 0.5, %v871_v19 }
 0x141   : > { %v873_v21 = vsub.f32 1.5, %v872_v20 }
 0x143   : > { %v874_v22 = vmul.f32 %v1757_v17, %v873_v21 }
 0x145   : > { %v878_v24 = vsel %vm877_vm4, %v1757_v17, %v874_v22 }
 0x146   : > { %v879_v26 = vmul.f32 %v878_v24, %v862_v11 }
 0x148   : > { %v883_v27 = vmul.f32 %v1752_v23, %v879_v26 }
 0x14a   : > { %v887_v28 = vadd.f32 %v1753_v25, %v883_v27 }
 0x14c   : > { %888 = vst.msk [vmem:[#allocation2] sm:$0xff] %vm850_vm0, %v887_v28 }
 0x14d PF: > { %v1661_v29 = vld [vmem:[%s2083_s17 + $0x8] sm:$0xff]  ;;  %v1660_v30 = vld [vmem:[%s2083_s17] sm:$0xff]  ;;  %vm911_vm5 = vcmask 261120   ;;  %s2378_s4 = scalar_lea.vmem %s2306_s5, %s2069_s0  ;;  %s1882_s20 = smov 112   ;;  %vm954_vm6 = vcmask 130048   ;;  %vm1021_vm7 = vcmask 1043456  }
 0x14e   : > { %921 = vmatpush.bf16.msra.mxu0 %v1661_v29  ;;  %v1758_v33 = vld [vmem:[%s2378_s4] ss:$0 sm:$0xff]  ;;  %s1883_s17 = smov 96   ;;  %s1884_s19 = smov 80   ;;  %vm993_vm8 = vcmask 64512   ;;  %v1663_v16 = vld [vmem:[%s2092_s28 + $0x8] sm:$0xff] }
 0x14f   : > { %s1885_s30 = smov 64   ;;  %s1886_s16 = smov 48   ;;  %v1662_v15 = vld [vmem:[%s2092_s28] sm:$0xff]  ;;  %vm1238_vm13 = vcmask 523264  }
 0x150   : > { %s2379_s10 = sld [smem:[#allocation19_spill]]  ;;  %s2381_s2 = scalar_lea.vmem %s2308_s7, %s2069_s0 }
 0x151   : > { %v1760_v26 = vld [vmem:[%s2381_s2] ss:$0 sm:$0xff]  ;;  %s2382_s29 = scalar_lea.vmem %s2309_s8, %s2069_s0  ;;  %s2383_s4 = sld [smem:[#allocation24_spill]] }
 0x152   : > { %922 = vmatpush.bf16.msra.mxu0 %v1660_v30  ;;  %s2388_s26 = sld [smem:[#allocation8_spill]] }
 0x153   : > { %v2149_v31 = vld [vmem:[#allocation2] sm:$0xff] }
 0x154   : > { %v890_v32 = vpack.c.bf16 %v2149_v31, %v2149_v31 }
 0x156   : > { %1594 = vmatmul.msk.bf16.vlgmr.msra.gmra.mxu0 %vm911_vm5, %v890_v32  ;;  %s2380_s24 = scalar_lea.vmem %s2379_s10, %s2066_s25 }
 0x157   : > { %v1759_v52 = vld [vmem:[%s2380_s24] ss:$0 sm:$0xff]  ;;  %1079 = vmatpush.bf16.msrb.mxu0 %v1662_v15 }
 0x158   : > { %p1635_p1 = scmp.ne.s32.totalorder %s2388_s26, 1 }
 0x159   : > { %s2390_s27 = sld [smem:[#allocation30_spill]] (!%p1635_p1) }
 0x1d3   : > { %v924_v34 = vpop.f32.mrf.mxu0 }
 0x1d4   : > { %v925_v35 = vadd.f32 %v1758_v33, %v924_v34 }
 0x1d6   : > { %929 = vrot.lane.b32.xlu1 %v925_v35, %s1882_s20  ;;  %932 = vrot.lane.b32.xlu0 %v925_v35, %s1883_s17  ;;  %v944_v42 = vpack.c.bf16 %v925_v35, %v925_v35  ;;  %s2384_s20 = scalar_lea.vmem %s2383_s4, %s2069_s0 }
 0x1db   : > { %v926_v36 = vpop.f32.mrf.mxu0 }
 0x1de   : > { %935 = vrot.lane.b32.xlu0 %v925_v35, %s1884_s19  ;;  %s2391_s19 = sld [smem:[#allocation29_spill]] (!%p1635_p1) }
 0x1e6   : > { %938 = vrot.lane.b32.xlu0 %v925_v35, %s1885_s30  ;;  %s2385_s30 = scalar_lea.vmem %s2312_s11, %s2069_s0 }
 0x1ee   : > { %941 = vrot.lane.b32.xlu0 %v925_v35, %s1886_s16  ;;  %v1887_v35 = vmov 32.0   ;;  %s2392_s16 = sld [smem:[#allocation31_spill]] (!%p1635_p1) }
 0x248   : > { %v933_v37 = vpop.permute.xlu0 %932  ;;  %v930_v44 = vpop.permute.xlu1 %929 }
 0x249   : > { %v946_v38 = vpack.c.bf16 %v933_v37, %v933_v37  ;;  %v945_v46 = vpack.c.bf16 %v930_v44, %v930_v44 }
 0x24b   : > { %v959_v39 = vsel %vm954_vm6, %v946_v38, 0 }
 0x24c   : > { %968 = vmatpush.bf16.xpose.msra.mxu1 %v959_v39 }
 0x250   : > { %v936_v40 = vpop.permute.xlu0 %935 }
 0x251   : > { %v947_v41 = vpack.c.bf16 %v936_v40, %v936_v40 }
 0x253   : > { %1595 = vmatmul.msk.bf16.vlgmr.msra.gmra.mxu1 %vm954_vm6, %v944_v42  ;;  %v978_v43 = vsel %vm954_vm6, %v947_v41, 0 }
 0x254   : > { %987 = vmatpush.bf16.xpose.msra.mxu2 %v978_v43  ;;  %1101 = vmatpush.bf16.msrb.mxu1 %v1663_v16 }
 0x258   : > { %v939_v45 = vpop.permute.xlu0 %938 }
 0x259   : > { %v948_v47 = vpack.c.bf16 %v939_v45, %v939_v45 }
 0x25b   : > { %1596 = vmatmul.msk.bf16.vlgmr.msra.gmra.mxu2 %vm954_vm6, %v945_v46  ;;  %v1023_v48 = vsel %vm1021_vm7, %v948_v47, 0  ;;  %v1665_v46 = vld [vmem:[%s2109_s18 + $0x8] sm:$0xff]  ;;  %v1664_v47 = vld [vmem:[%s2109_s18] sm:$0xff]  ;;  %s2389_s18 = sld [smem:[#allocation28_spill]] (!%p1635_p1) }
 0x25c   : > { %1032 = vmatpush.bf16.msra.mxu3 %v1023_v48  ;;  %1185 = vmatpush.bf16.msrb.mxu2 %v1665_v46 }
 0x260   : > { %v942_v49 = vpop.permute.xlu0 %941  ;;  %1186 = vmatpush.bf16.msrb.mxu2 %v1664_v47 }
 0x261   : > { %v949_v50 = vpack.c.bf16 %v942_v49, %v942_v49 }
 0x263   : > { %v1042_v51 = vsel %vm1021_vm7, %v949_v50, 0 }
 0x264   : > { %1051 = vmatpush.bf16.msrb.mxu3 %v1042_v51 }
 0x2d0   : > { %v970_v53 = vpop.f32.mrf.mxu1 }
 0x2d1   : > { %v971_v54 = vadd.f32 %v1759_v52, %v970_v53 }
 0x2d3   : > { %v994_v55 = vsel %vm993_vm8, %v971_v54, -inf }
 0x2d4   : > { %995 = vmax.xlane.f32.xlu1 %v994_v55 }
 0x2d8   : > { %v972_v56 = vpop.f32.mrf.mxu1 }
 0x2de   : > { %v989_v57 = vpop.f32.mrf.mxu2 }
 0x2df   : > { %v990_v58 = vadd.f32 %v1759_v52, %v989_v57  ;;  %v1761_v57 = vld [vmem:[%s2382_s29] ss:$0 sm:$0xff] }
 0x2e1   : > { %v997_v59 = vsel %vm993_vm8, %v990_v58, -inf }
 0x2e2   : > { %998 = vmax.xlane.f32.xlu2 %v997_v59 }
 0x2e6   : > { %v991_v60 = vpop.f32.mrf.mxu2 }
 0x2e7   : > { %v1762_v60 = vld [vmem:[%s2384_s20] ss:$0 sm:$0xff] }
 0x347   : > { %v996_v61 = vpop.xlane.xlu1 %995 }
 0x348   : > { %v1000_v62 = vsub.f32 %v971_v54, %v996_v61 }
 0x34a   : > { %v1002_v63 = vmul.f32 1.442695, %v1000_v62 }
 0x34c   : > { %1767 = vpow2.f32 %v1002_v63 }
 0x352   : > { %v1768_v0 = vpop.eup %1767 }
 0x353   : > { %v1006_v1 = vsel %vm993_vm8, %v1768_v0, 0.0 }
 0x354   : > { %1007 = vadd.xlane.f32.xlu2 %v1006_v1  ;;  %v1668_v1 = vld [vmem:[%s2123_s21 + $0x10] sm:$0xff] }
 0x355   : > { %v999_v2 = vpop.xlane.xlu2 %998 }
 0x356   : > { %v1001_v3 = vsub.f32 %v990_v58, %v999_v2  ;;  %v1667_v2 = vld [vmem:[%s2123_s21 + $0x8] sm:$0xff] }
 0x358   : > { %v1004_v4 = vmul.f32 1.442695, %v1001_v3  ;;  %v1666_v3 = vld [vmem:[%s2123_s21] sm:$0xff] }
 0x35a   : > { %1769 = vpow2.f32 %v1004_v4  ;;  %v1763_v4 = vld [vmem:[%s2385_s30] ss:$0 sm:$0xff] }
 0x360   : > { %v1770_v5 = vpop.eup %1769 }
 0x361   : > { %v1009_v6 = vsel %vm993_vm8, %v1770_v5, 0.0 }
 0x362   : > { %1010 = vadd.xlane.f32.xlu2 %v1009_v6 }
 0x3c7   : > { %v1008_v7 = vpop.xlane.xlu2 %1007 }
 0x3c8   : > { %1771 = vrcp.f32 %v1008_v7 }
 0x3ce   : > { %v1772_v8 = vpop.eup %1771 }
 0x3cf   : > { %v1014_v9 = vmul.f32 %v1772_v8, %v1768_v0  ;;  %v1669_v0 = vld [vmem:[%s2123_s21 + $0x18] sm:$0xff] }
 0x3d1   : > { %v1016_v10 = vpack.c.bf16 %v1014_v9, %v1014_v9 }
 0x3d3   : > { %1597 = vmatmul.msk.bf16.vlgmr.msra.gmra.mxu3 %vm993_vm8, %v1016_v10 }
 0x3d4   : > { %1246 = vmatpush.bf16.msra.mxu3 %v1669_v0 }
 0x3d5   : > { %v1011_v11 = vpop.xlane.xlu2 %1010 }
 0x3d6   : > { %1773 = vrcp.f32 %v1011_v11 }
 0x3d7   : > { %1775 = vrcp.f32 %v1887_v35 }
 0x3d8   : > { %1247 = vmatpush.bf16.msra.mxu3 %v1668_v1 }
 0x3dc   : > { %v1774_v12 = vpop.eup %1773  ;;  %1248 = vmatpush.bf16.msra.mxu3 %v1667_v2 }
 0x3dd   : > { %v1015_v13 = vmul.f32 %v1774_v12, %v1770_v5  ;;  %v1776_v36 = vpop.eup %1775 }
 0x3de   : > { %v1122_v37 = vmul.f32 32.0, %v1776_v36  ;;  %vm1126_vm9 = vweird.f32 %v1776_v36 }
 0x3df   : > { %v1017_v14 = vpack.c.bf16 %v1015_v13, %v1015_v13 }
 0x3e0   : > { %v1123_v38 = vsub.f32 1.0, %v1122_v37  ;;  %1249 = vmatpush.bf16.msra.mxu3 %v1666_v3 }
 0x3e2   : > { %v1124_v39 = vmul.f32 %v1776_v36, %v1123_v38 }
 0x3e3   : > { %1598 = vmatmul.msk.bf16.vlgmr.msrb.gmra.mxu3 %vm993_vm8, %v1017_v14 }
 0x3e4   : > { %v1125_v40 = vadd.f32 %v1776_v36, %v1124_v39  ;;  %v1765_v39 = vld [vmem:[%s838_s3] ss:$0 sm:$0xff] }
 0x3e6   : > { %v2187_v41 = vsel %vm1126_vm9, %v1776_v36, %v1125_v40 }
 0x456   : > { %v1034_v17 = vpop.f32.mrf.mxu3 }
 0x457   : > { %v1057_v18 = vpack.c.bf16 %v1034_v17, %v1034_v17 }
 0x459   : > { %1603 = vmatmul.msk.bf16.vlgmr.msrb.gmra.mxu0 %vm954_vm6, %v1057_v18  ;;  %v1764_v18 = vld [vmem:[%s835_s23] ss:$0 sm:$0xff] }
 0x45e   : > { %v1036_v19 = vpop.f32.mrf.mxu3 }
 0x466   : > { %v1053_v20 = vpop.f32.mrf.mxu3 }
 0x467   : > { %v1058_v21 = vpack.c.bf16 %v1053_v20, %v1053_v20 }
 0x469   : > { %1608 = vmatmul.msk.bf16.vlgmr.msrb.gmra.mxu1 %vm954_vm6, %v1058_v21 }
 0x46e   : > { %v1055_v22 = vpop.f32.mrf.mxu3 }
 0x4d6   : > { %v1081_v23 = vpop.f32.mrf.mxu0 }
 0x4d7   : > { %v1107_v27 = vsel %vm911_vm5, %v1081_v23, 0.0 }
 0x4de   : > { %v1083_v24 = vpop.f32.mrf.mxu0 }
 0x4e6   : > { %v1103_v25 = vpop.f32.mrf.mxu1 }
 0x4e7   : > { %v1108_v28 = vsel %vm911_vm5, %v1103_v25, 0.0 }
 0x4e8   : > { %v1109_v29 = vadd.f32 %v1108_v28, %v1107_v27 }
 0x4ea   : > { %v1114_v30 = vadd.f32 %v1760_v26, %v1109_v29 }
 0x4ec   : > { %v1115_v32 = vadd.f32 %v1114_v30, %v2149_v31 }
 0x4ee   : > { %v1105_v33 = vpop.f32.mrf.mxu1  ;;  %v1118_v34 = vsel %vm911_vm5, %v1115_v32, 0.0 }
 0x4ef   : > { %1119 = vadd.xlane.f32.xlu2 %v1118_v34 }
 0x562   : > { %v1120_v42 = vpop.xlane.xlu2 %1119 }
 0x563   : > { %v1128_v43 = vmul.f32 %v2187_v41, %v1120_v42 }
 0x565   : > { %v1129_v31 = vsub.f32 %v1115_v32, %v1128_v43 }
 0x567   : > { %v1130_v44 = vmul.f32 %v1129_v31, %v1129_v31 }
 0x569   : > { %v1131_v45 = vsel %vm911_vm5, %v1130_v44, 0.0 }
 0x56a   : > { %1132 = vadd.xlane.f32.xlu0 %v1131_v45 }
 0x5dd   : > { %v1133_v48 = vpop.xlane.xlu0 %1132 }
 0x5de   : > { %v1134_v49 = vmul.f32 %v1133_v48, %v2187_v41 }
 0x5e0   : > { %v1135_v50 = vadd.f32 1e-12, %v1134_v49 }
 0x5e2   : > { %1777 = vrsqrt.f32 %v1135_v50  ;;  %vm1142_vm11 = vweird.f32 %v1135_v50 }
 0x5e8   : > { %v1778_v51 = vpop.eup %1777 }
 0x5e9   : > { %v1137_v52 = vmul.f32 %v1778_v51, %v1135_v50  ;;  %vm1143_vm10 = vweird.f32 %v1778_v51 }
 0x5ea   : > { %vm1144_vm12 = vmor %vm1142_vm11, %vm1143_vm10 }
 0x5eb   : > { %v1138_v53 = vmul.f32 %v1778_v51, %v1137_v52 }
 0x5ed   : > { %v1139_v54 = vmul.f32 0.5, %v1138_v53 }
 0x5ef   : > { %v1140_v55 = vsub.f32 1.5, %v1139_v54 }
 0x5f1   : > { %v1141_v56 = vmul.f32 %v1778_v51, %v1140_v55 }
 0x5f3   : > { %v1145_v58 = vsel %vm1144_vm12, %v1778_v51, %v1141_v56 }
 0x5f4   : > { %v1146_v59 = vmul.f32 %v1145_v58, %v1129_v31 }
 0x5f6   : > { %v1150_v61 = vmul.f32 %v1761_v57, %v1146_v59 }
 0x5f8   : > { %v1154_v62 = vadd.f32 %v1762_v60, %v1150_v61 }
 0x5fa   : > { %v1155_v63 = vpack.c.bf16 %v1154_v62, %v1154_v62 }
 0x5fc   : > { %1617 = vmatmul.msk.bf16.vlgmr.msrb.gmra.mxu2 %vm911_vm5, %v1155_v63 }
 0x67f   : > { %v1188_v5 = vpop.f32.mrf.mxu2 }
 0x680   : > { %v1189_v6 = vadd.f32 %v1763_v4, %v1188_v5 }
 0x682   : > { %v1193_v7 = vmul.f32 0.044715, %v1189_v6  ;;  %v1192_v14 = vmul.f32 0.5, %v1189_v6 }
 0x684   : > { %v1194_v8 = vmul.f32 %v1193_v7, %v1189_v6 }
 0x686   : > { %v1195_v9 = vmul.f32 %v1194_v8, %v1189_v6 }
 0x687   : > { %v1190_v10 = vpop.f32.mrf.mxu2 }
 0x688   : > { %v1196_v11 = vadd.f32 %v1195_v9, %v1189_v6 }
 0x68a   : > { %v1197_v12 = vmul.f32 0.7978846, %v1196_v11 }
 0x68c   : > { %1779 = vtanh.f32 %v1197_v12 }
 0x692   : > { %v1780_v13 = vpop.eup %1779 }
 0x693   : > { %v1199_v15 = vadd.f32 1.0, %v1780_v13 }
 0x695   : > { %v1200_v16 = vmul.f32 %v1199_v15, %v1192_v14 }
 0x697   : > { %v1201_v17 = vpack.c.bf16 %v1200_v16, %v1200_v16 }
 0x699   : > { %1634 = vmatmul.msk.bf16.vlgmr.msra.gmra.mxu3 %vm1238_vm13, %v1201_v17 }
 0x71c   : > { %v1251_v19 = vpop.f32.mrf.mxu3 }
 0x71d   : > { %v1252_v20 = vadd.f32 %v1764_v18, %v1251_v19 }
 0x71f   : > { %v1255_v21 = vadd.f32 %v1252_v20, %v1154_v62 }
 0x721   : > { %v1258_v22 = vsel %vm911_vm5, %v1255_v21, 0.0 }
 0x722   : > { %1259 = vadd.xlane.f32.xlu2 %v1258_v22 }
 0x724   : > { %v1253_v23 = vpop.f32.mrf.mxu3 }
 0x795   : > { %v1260_v24 = vpop.xlane.xlu2 %1259 }
 0x796   : > { %v1261_v25 = vmul.f32 %v1260_v24, %v2187_v41 }
 0x798   : > { %v1262_v26 = vsub.f32 %v1255_v21, %v1261_v25 }
 0x79a   : > { %v1263_v27 = vmul.f32 %v1262_v26, %v1262_v26 }
 0x79c   : > { %v1264_v28 = vsel %vm911_vm5, %v1263_v27, 0.0 }
 0x79d   : > { %1265 = vadd.xlane.f32.xlu2 %v1264_v28 }
 0x810   : > { %v1266_v29 = vpop.xlane.xlu2 %1265 }
 0x811   : > { %v1267_v30 = vmul.f32 %v1266_v29, %v2187_v41  ;;  %v1766_v41 = vld [vmem:[%s841_s9] ss:$0 sm:$0xff] }
 0x813   : > { %v1268_v32 = vadd.f32 1e-12, %v1267_v30 }
 0x815   : > { %1781 = vrsqrt.f32 %v1268_v32  ;;  %vm1275_vm15 = vweird.f32 %v1268_v32 }
 0x81b   : > { %v1782_v33 = vpop.eup %1781 }
 0x81c   : > { %v1270_v34 = vmul.f32 %v1782_v33, %v1268_v32  ;;  %vm1276_vm14 = vweird.f32 %v1782_v33 }
 0x81d   : > { %vm1277_vm0 = vmor %vm1275_vm15, %vm1276_vm14 }
 0x81e   : > { %v1271_v35 = vmul.f32 %v1782_v33, %v1270_v34 }
 0x820   : > { %v1272_v36 = vmul.f32 0.5, %v1271_v35 }
 0x822   : > { %v1273_v37 = vsub.f32 1.5, %v1272_v36 }
 0x824   : > { %v1274_v38 = vmul.f32 %v1782_v33, %v1273_v37 }
 0x826   : > { %v1278_v40 = vsel %vm1277_vm0, %v1782_v33, %v1274_v38 }
 0x827   : > { %v1279_v42 = vmul.f32 %v1278_v40, %v1262_v26 }
 0x829   : > { %v1283_v43 = vmul.f32 %v1765_v39, %v1279_v42  ;;  %1292 = sbr.rel (%p1635_p1) target bundleno = 2373 (0x945), region = 108 }
 0x82b   : > { %v1287_v31 = vadd.f32 %v1766_v41, %v1283_v43 }
 0x82d   : > { %1288 = vst.msk [vmem:[#allocation2] sm:$0xff] %vm911_vm5, %v1287_v31 }
 0x82e   : > { %v1671_v44 = vld [vmem:[%s2389_s18 + $0x8] sm:$0xff]  ;;  %v1670_v45 = vld [vmem:[%s2389_s18] sm:$0xff]  ;;  %v1293_v46 = vpack.c.bf16 %v1287_v31, %v1287_v31 }
 0x82f   : > { %1320 = vmatpush.bf16.msra.mxu0 %v1671_v44  ;;  %v1673_v47 = vld [vmem:[%s2390_s27 + $0x8] sm:$0xff]  ;;  %v1672_v48 = vld [vmem:[%s2390_s27] sm:$0xff] }
 0x830   : > { %1355 = vmatpush.bf16.msra.mxu1 %v1673_v47  ;;  %v1298_v49 = vld [vmem:[%s2391_s19] sm:$0x1] }
 0x831   : > { %v1333_v55 = vld [vmem:[%s2392_s16] sm:$0x1] }
 0x833   : > { %1321 = vmatpush.bf16.msra.mxu0 %v1670_v45 }
 0x834   : > { %1356 = vmatpush.bf16.msra.mxu1 %v1672_v48 }
 0x836   : > { %1644 = vmatmul.msk.bf16.vlgmr.msra.gmra.mxu0 %vm911_vm5, %v1293_v46 }
 0x8b3   : > { %v1323_v50 = vpop.f32.mrf.mxu0 }
 0x8b4   : > { %v1324_v51 = vadd.f32 %v1323_v50, %v1298_v49 }
 0x8b6   : > { %1783 = vtanh.f32 %v1324_v51 }
 0x8bb   : > { %v1325_v52 = vpop.f32.mrf.mxu0 }
 0x8bc   : > { %v1784_v53 = vpop.eup %1783 }
 0x8bd   : > { %v1328_v54 = vpack.c.bf16 %v1784_v53, %v1784_v53 }
 0x8bf   : > { %1653 = vmatmul.msk.bf16.vlgmr.msra.gmra.mxu1 %vm911_vm5, %v1328_v54 }
 0x93c   : > { %v1358_v56 = vpop.f32.mrf.mxu1 }
 0x93d   : > { %v1359_v57 = vadd.f32 %v1358_v56, %v1333_v55 }
 0x93f   : > { %1362 = vst [vmem:[%s2135_s15] sm:$0x1] %v1359_v57 }
 0x944   : > { %v1360_v58 = vpop.f32.mrf.mxu1 }
 0x945 PF: > { %s2393_s23 = sld [smem:[#allocation9_spill]]  ;;  %s1374_s26 = sshll.u32 %s2135_s15, 4  ;;  %s1375_s26 = int_to_ptr.vmem [resolvable:$true] %s1374_s26 }
 0x946   : > { %s2394_s10 = sld [smem:[#allocation32_spill]]  ;;  %s2396_s28 = sand.u32 1, %s1855_s22  }
 0x947   : > { %s1364_s3 = scalar_lea.sflag [#allocation4], %s2396_s28 }
 0x94c   : > { %s1372_s25 = scalar_lea.hbm %s2394_s10, %s2393_s23  ;;  %s1805_s4 = scalar_lea.hbm %s2394_s10, 2 }
 0x94d   : > { %s1376_s2 = sshll.u32 %s1372_s25, 4  ;;  %s1377_s2 = int_to_ptr.hbm [resolvable:$true] %s1376_s2 }
 0x94e   : > { %s1799_s29 = sshra.s32 %s1377_s2, 4  ;;  %s1800_s29 = int_to_ptr.hbm [resolvable:$true] %s1799_s29 }
 0x94f   : > { %s1801_s9 = scalar_lea.hbm %s1800_s29, 1  ;;  %p1806_p6 = scmp.lt.s32.totalorder %s1800_s29, %s2394_s10 }
 0x950   : > { %p1802_p2 = scmp.ne.s32.totalorder %s1800_s29, %s1801_s9  ;;  %p1807_p7 = scmp.lt.s32.totalorder %s1805_s4, %s1801_s9 }
 0x952   : > { %p1803_p4 = pnand %p1802_p2, %p2042_p3  ;;  %p1808_p8 = por %p1807_p7, %p1806_p6 }
 0x954   : > { %p1804_p5 = pneg %p1803_p4 }
 0x956   : > { %p1809_p10 = pnand %p1808_p8, %p1804_p5 }
 0x958   : > { %1812 = shalt.err (!%p1809_p10)
}
 0x959   : > { %1674 = dma.vmem_to_hbm [thread:$0]  (%p2042_p3), %s1375_s26, 16, %s1377_s2, %s1364_s3  }
 0x95a PF: > { %s2397_s15 = sld [smem:[#allocation12_spill]] }
 0x95b   : > { %s2398_s19 = sld [smem:[#allocation6_spill]] }
 0x960   : > { %p1680_p11 = scmp.ge.s32.totalorder %s2397_s15, 2 }
 0x961   : > { %s1388_s21 = sand.u32 1, %s2398_s19  }
 0x962   : > { %p1677_p12 = pnand %p1680_p11, %p2052_p9  ;;  %s1389_s16 = scalar_lea.sflag [#allocation4], %s1388_s21 }
 0x964   : > { %p1678_p13 = pneg %p1677_p12 }
 0x966   : > { %1846 = dma.done.wait (%p1678_p13), %s1389_s16, 16  }
 0x967   : > { %1848 = vsyncadd (%p1678_p13), %s1389_s16, 4294967280  ;;  %s33_s26 = sadd.s32 1, %s2397_s15   ;;  %s2400_s23 = sld [smem:[#allocation7_spill]] }
 0x968   : > { %p30_p0 = scmp.ge.s32.totalorder %s33_s26, 6   ;;  %s2401_s14 = sld [smem:[#allocation17_spill]] }
 0x969   : > { %s2402_s24 = sld [smem:[#allocation10_spill]]  ;;  %s2406_s1 = smov %s1855_s22 }
 0x96a   : > { %s2403_s2 = sld [smem:[#allocation11_spill]]  ;;  %32 = sbr.rel (!%p30_p0) target bundleno = 21 (0x15), region = 182 }
 0x96b   : > { %s2404_s25 = sld [smem:[#allocation13_spill]] }
 0x96c   : > { %s2405_s3 = sld [smem:[#allocation15_spill]] }
 0x96d   : > { %s2407_s22 = smov %s2400_s23 }
 0x96e   : > { %s2408_s23 = smov %s2401_s14 }
 0x96f   :  { %1394 = vsyncpa [#allocation4], 1 }
 0x970   :  { %1396 = vsyncpa [#allocation4 + $0x1], 1 }

</bundles_post_ra>
